<compile_context>
chip_gen: v7x
topology: tpu7x:2x2x1
jax: 0.10.0
libtpu: 0.0.40
codegen_flags: <defaults>
</compile_context>

<pallas_src>
import functools

import jax
import jax.numpy as jnp
from jax.experimental import pallas as pl
from jax.experimental.pallas import tpu as pltpu


# ----------------------------------------------------------------------------
# Pallas kernel: NB images per grid step, fully fused block.
# ----------------------------------------------------------------------------
def _qblock_kernel(*refs, stride):
    # x_ref   : (NB, H, W*Cin)         input slab, lanes = W*Cin
    # band_ref: (3, W*Cin, W*Cin)      banded depthwise matrices (BN1 scale folded)
    # b1_ref  : (1, W*Cin)             folded BN1 bias tiled over W
    # bd_ref  : (W*Cin, Wout*Cout)     block-diag pointwise weight (+ W stride,
    #                                  BN2 scale folded)
    # b2_ref  : (1, Wout*Cout)         folded BN2 bias tiled over Wout
    # m0/m2   : (NB*H, 1)              per-image boundary masks for the +-1 taps
    # selh_ref: (NB*Hout, NB*H)        0/1 H-stride row decimation (stride>1 only)
    # o_ref   : (NB, Hout, Wout*Cout)  lane-dense output slab
    if stride == 1:
        x_ref, band_ref, b1_ref, bd_ref, b2_ref, m0_ref, m2_ref, o_ref = refs
        selh_ref = None
    else:
        (x_ref, band_ref, b1_ref, bd_ref, b2_ref, m0_ref, m2_ref,
         selh_ref, o_ref) = refs

    NB, H, WC = x_ref.shape
    _, Hout, WoutCout = o_ref.shape
    M = NB * H
    wdtype = band_ref.dtype

    # Contiguous lane-dense LHS; collapsing leading dims is layout-free.
    x = x_ref[...].reshape(M, WC)

    # +-1 H shifts for the outer depthwise taps on the XLU (no halo scratch,
    # no windowed slice copies).  Rows that would read the zero H padding (or a
    # neighbouring image after the flat roll) are zeroed by the masks below;
    # masking the tap *output* rows is equivalent since row r of (rows @ band)
    # depends only on row r of rows.
    x_up = pltpu.roll(x, 1, 0)        # row r <- x[r-1]   (kernel row ky = 0)
    x_dn = pltpu.roll(x, M - 1, 0)    # row r <- x[r+1]   (kernel row ky = 2)

    def tap(lhs, ky):
        # Banded matmul realizes the +/-1 W shift, per-channel weights, BN1
        # scale and the W zero padding on the MXU with dense, aligned lanes.
        return jnp.dot(lhs.astype(wdtype), band_ref[ky],
                       preferred_element_type=jnp.float32)

    acc = tap(x, 1)
    acc = acc + m0_ref[...] * tap(x_up, 0)
    acc = acc + m2_ref[...] * tap(x_dn, 2)

    # BN1 (scale already folded into band) + ReLU, f32 on the VPU.
    h = jnp.maximum(acc + b1_ref[...], 0.0)              # (M, WC)
    h = h.astype(wdtype)

    # stride > 1: decimate to the strided output rows with a 0/1 block-diagonal
    # selection matmul (stays on the MXU; no strided sublane slices).
    if stride > 1:
        h = jnp.dot(selh_ref[...], h,
                    preferred_element_type=jnp.float32).astype(wdtype)

    # Pointwise 1x1 conv (+ W stride + BN2 scale) as one lane-dense matmul; the
    # result already has the (Mout, Wout*Cout) layout for an unmasked store.
    h2 = jnp.dot(h, bd_ref[...], preferred_element_type=jnp.float32)

    out = jnp.maximum(h2 + b2_ref[...], 0.0)
    o_ref[...] = out.reshape(NB, Hout, WoutCout).astype(o_ref.dtype)


# ----------------------------------------------------------------------------
# Wrapper
# ----------------------------------------------------------------------------
def qblock_forward(x, params, *, stride=1, batch_block=None,
                   mxu_dtype=jnp.bfloat16, out_dtype=jnp.float32, nhwc=False):
    """QBlock forward.

    x: (N, Cin, H, W) (NCHW, default) or (N, H, W, Cin) if nhwc=True.
    Returns NCHW (or NHWC if nhwc=True) with dtype `out_dtype`.
    """
    w_dw = params["w_dw"].astype(jnp.float32)           # (3, 3, Cin)
    w_pw = params["w_pw"].astype(jnp.float32)           # (Cin, Cout)
    s1, b1 = params["bn1_scale"], params["bn1_bias"]    # (Cin,)
    s2, b2 = params["bn2_scale"], params["bn2_bias"]    # (Cout,)

    if nhwc:
        N, H, W, Cin = x.shape
        x_nhwc = x
    else:
        N, Cin, H, W = x.shape
        x_nhwc = jnp.transpose(x, (0, 2, 3, 1))
    Cout = w_pw.shape[1]
    Hout = (H - 1) // stride + 1
    Wout = (W - 1) // stride + 1
    WC = W * Cin
    WoutCout = Wout * Cout

    # ---- per-step batch block ----------------------------------------------
    if batch_block is None:
        # Target M = NB*Hout ~ 256 (fills v6e/v7x's 256-wide MXU in one pass,
        # harmless on v5e) and amortize the ~0.35us/step grid overhead, while
        # keeping >= 2 grid steps when possible so v7x's two TensorCores both
        # get work and the input/output DMA pipelines.
        nb = max(1, 256 // max(Hout, 1))
        nb = min(nb, 64)                       # VMEM headroom cap
        if N >= 2:
            nb = min(nb, max(1, N // 2))
        nb = min(nb, N)
        # Prefer NB dividing N (skips the zero-pad HBM concat + wasted step);
        # only fall back to padding if that would shrink NB by more than 2x.
        best_div = max(d for d in range(1, nb + 1) if N % d == 0)
        if 2 * best_div >= nb:
            nb = best_div
        batch_block = nb
    NB = max(1, min(batch_block, N))
    n_steps = pl.cdiv(N, NB)
    Npad = n_steps * NB

    # (N, H, W*Cin): W and Cin share the 128-wide lane axis.
    x_flat = x_nhwc.reshape(N, H, WC)
    if Npad != N:
        x_flat = jnp.concatenate(
            [x_flat, jnp.zeros((Npad - N, H, WC), x_flat.dtype)], axis=0)

    # ---- depthwise 3x3 as three banded (WC, WC) matrices, BN1 scale folded --
    # band[ky][m*Cin + c, j*Cin + c] = w_dw[ky, m - j + 1, c] * s1[c], |m-j|<=1;
    # the W zero padding is implicit (missing rows contribute 0).
    m_idx = jnp.arange(W)[:, None]
    j_idx = jnp.arange(W)[None, :]
    t = m_idx - j_idx + 1                                   # tap index along W
    valid = ((t >= 0) & (t <= 2)).astype(jnp.float32)       # (W, W)
    tc = jnp.clip(t, 0, 2)
    wsel = w_dw[:, tc, :] * valid[None, :, :, None]         # (3, W, W, Cin)
    eye_c = jnp.eye(Cin, dtype=jnp.float32)
    band = jnp.einsum("dmjc,ck->dmcjk", wsel, eye_c).reshape(3, WC, WC)
    band = band * jnp.tile(s1, W)[None, None, :]            # fold BN1 scale

    # ---- pointwise 1x1 conv as block-diagonal (WC, Wout*Cout); the column
    # selector applies the W stride, BN2 scale is folded into the columns. ----
    col_sel = (jnp.arange(W)[:, None] == stride * jnp.arange(Wout)[None, :])
    bd = jnp.einsum("mj,io->mijo", col_sel.astype(jnp.float32),
                    w_pw).reshape(WC, WoutCout)
    bd = bd * jnp.tile(s2, Wout)[None, :]                   # fold BN2 scale

    # Biases stay f32 (added to the f32 accumulators in-kernel).
    b1_l = jnp.tile(b1, W).reshape(1, WC).astype(jnp.float32)
    b2_l = jnp.tile(b2, Wout).reshape(1, WoutCout).astype(jnp.float32)

    # Per-row boundary masks for the rolled +-1 H taps.
    rows = jnp.arange(NB * H) % H
    m0 = (rows != 0).astype(jnp.float32).reshape(NB * H, 1)
    m2 = (rows != H - 1).astype(jnp.float32).reshape(NB * H, 1)

    # bf16 (default) MXU operands: single-pass matmuls on all generations and
    # half the weight VMEM/DMA; weights are 4-bit fake-quant so the precision
    # cost is negligible.  TODO(synk): optional fp8 (e4m3) weight path on v7x.
    band = band.astype(mxu_dtype)
    bd = bd.astype(mxu_dtype)

    inputs = [x_flat, band, b1_l, bd, b2_l, m0, m2]
    in_specs = [
        pl.BlockSpec((NB, H, WC),     lambda n: (n, 0, 0)),
        pl.BlockSpec((3, WC, WC),     lambda n: (0, 0, 0)),
        pl.BlockSpec((1, WC),         lambda n: (0, 0)),
        pl.BlockSpec((WC, WoutCout),  lambda n: (0, 0)),
        pl.BlockSpec((1, WoutCout),   lambda n: (0, 0)),
        pl.BlockSpec((NB * H, 1),     lambda n: (0, 0)),
        pl.BlockSpec((NB * H, 1),     lambda n: (0, 0)),
    ]
    if stride > 1:
        # 0/1 H-stride row decimation, block-diagonal over the NB images.
        Mout, Mfull = NB * Hout, NB * H
        n_i = jnp.arange(NB)[:, None]
        r_i = jnp.arange(Hout)[None, :]
        selh = jnp.zeros((Mout, Mfull), jnp.float32).at[
            (n_i * Hout + r_i).reshape(-1),
            (n_i * H + stride * r_i).reshape(-1)].set(1.0).astype(mxu_dtype)
        inputs.append(selh)
        in_specs.append(pl.BlockSpec((Mout, Mfull), lambda n: (0, 0)))

    kernel = functools.partial(_qblock_kernel, stride=stride)

    out_flat = pl.pallas_call(
        kernel,
        out_shape=jax.ShapeDtypeStruct((Npad, Hout, WoutCout), out_dtype),
        grid_spec=pltpu.PrefetchScalarGridSpec(
            num_scalar_prefetch=0,
            grid=(n_steps,),
            in_specs=in_specs,
            out_specs=pl.BlockSpec((NB, Hout, WoutCout), lambda n: (n, 0, 0)),
        ),
        compiler_params=pltpu.CompilerParams(
            dimension_semantics=("parallel",)),
    )(*inputs)

    out = out_flat[:N].reshape(N, Hout, Wout, Cout)
    if nhwc:
        return out
    return jnp.transpose(out, (0, 3, 1, 2))                 # NCHW interface


# ----------------------------------------------------------------------------
# Deterministic parameter construction (synthetic; mirrors __init__ shapes)
# ----------------------------------------------------------------------------
def fake_quant_weight(w, num_bits=4):
    # TODO(synk): exact QConv2d quantization scheme is not in the snippet;
    # using symmetric per-tensor weight fake-quantization (quantize-dequantize).
    qmax = float(2 ** (num_bits - 1) - 1)
    scale = jnp.maximum(jnp.max(jnp.abs(w)), 1e-8) / qmax
    return jnp.clip(jnp.round(w / scale), -qmax - 1, qmax) * scale


def make_params(key, in_planes, out_planes, num_bits=4, eps=1e-5):
    k1, k2 = jax.random.split(key, 2)
    w_dw = 0.1 * jax.random.normal(k1, (3, 3, in_planes), jnp.float32)
    w_pw = 0.1 * jax.random.normal(k2, (in_planes, out_planes), jnp.float32)
    w_dw = fake_quant_weight(w_dw, num_bits)
    w_pw = fake_quant_weight(w_pw, num_bits)

    def bn_fold(c):
        gamma = 1.0 + 0.01 * jnp.arange(c, dtype=jnp.float32)
        beta = 0.05 * jnp.arange(c, dtype=jnp.float32)
        mean = 0.02 * jnp.arange(c, dtype=jnp.float32)
        var = 1.0 + 0.03 * jnp.arange(c, dtype=jnp.float32)
        scale = gamma / jnp.sqrt(var + eps)
        bias = beta - mean * scale
        return scale, bias

    s1, b1 = bn_fold(in_planes)
    s2, b2 = bn_fold(out_planes)
    return {"w_dw": w_dw, "w_pw": w_pw,
            "bn1_scale": s1, "bn1_bias": b1,
            "bn2_scale": s2, "bn2_bias": b2}


# ----------------------------------------------------------------------------
# Pure-JAX f32 reference (same math via lax conv) for a sanity check.
# ----------------------------------------------------------------------------
def reference_forward(x_nchw, params, *, stride=1):
    x = jnp.transpose(x_nchw, (0, 2, 3, 1))                       # NHWC
    Cin = x.shape[-1]
    w_dw = params["w_dw"].reshape(3, 3, 1, Cin)                   # HWIO depthwise
    dn = jax.lax.conv_dimension_numbers(x.shape, w_dw.shape,
                                        ("NHWC", "HWIO", "NHWC"))
    y = jax.lax.conv_general_dilated(x, w_dw, (stride, stride), ((1, 1), (1, 1)),
                                     dimension_numbers=dn, feature_group_count=Cin)
    y = jnp.maximum(y * params["bn1_scale"] + params["bn1_bias"], 0.0)
    y = jnp.einsum("nhwc,co->nhwo", y, params["w_pw"])
    y = jnp.maximum(y * params["bn2_scale"] + params["bn2_bias"], 0.0)
    return jnp.transpose(y, (0, 3, 1, 2))


if __name__ == "__main__":
    N, Cin, Cout, H, W = 2, 8, 16, 16, 16

    key = jax.random.PRNGKey(0)
    kx, kp = jax.random.split(key)
    x = jax.random.normal(kx, (N, Cin, H, W), jnp.float32)
    params = make_params(kp, Cin, Cout, num_bits=4)

    for stride in (1, 2):
        fwd = jax.jit(functools.partial(qblock_forward, stride=stride))
        out = jax.block_until_ready(fwd(x, params))
        ref = jax.block_until_ready(reference_forward(x, params, stride=stride))
        Hout = (H - 1) // stride + 1
        Wout = (W - 1) // stride + 1
        assert out.shape == (N, Cout, Hout, Wout), out.shape
        # bf16 MXU operands (default) vs. the f32 lax reference -> relaxed tol.
        assert jnp.allclose(out, ref, rtol=5e-2, atol=1e-1), \
            float(jnp.max(jnp.abs(out - ref)))

    print("KERNEL_OK")
</pallas_src>

<mosaic_0001>
module attributes {stable_mosaic.version = 11 : i64} {
  func.func @_qblock_kernel(%arg0: i32, %arg1: memref<1x16x128xf32, #tpu.memory_space<vmem>>, %arg2: memref<3x128x128xbf16, #tpu.memory_space<vmem>>, %arg3: memref<1x128xf32, #tpu.memory_space<vmem>>, %arg4: memref<128x256xbf16, #tpu.memory_space<vmem>>, %arg5: memref<1x256xf32, #tpu.memory_space<vmem>>, %arg6: memref<16x1xf32, #tpu.memory_space<vmem>>, %arg7: memref<16x1xf32, #tpu.memory_space<vmem>>, %arg8: memref<1x16x256xf32, #tpu.memory_space<vmem>>) attributes {dimension_semantics = [#tpu.dimension_semantics<parallel>], iteration_bounds = array<i64: 2>, scalar_prefetch = 0 : i64, scratch_operands = 0 : i64, tpu.core_type = #tpu.core_type<tc>, window_params = [{transform_indices = @transform_0, window_bounds = array<i64: 1, 16, 128>}, {pipeline_mode = #tpu.pipeline_mode<synchronous>, transform_indices = @transform_1, window_bounds = array<i64: 3, 128, 128>}, {pipeline_mode = #tpu.pipeline_mode<synchronous>, transform_indices = @transform_2, window_bounds = array<i64: 1, 128>}, {pipeline_mode = #tpu.pipeline_mode<synchronous>, transform_indices = @transform_3, window_bounds = array<i64: 128, 256>}, {pipeline_mode = #tpu.pipeline_mode<synchronous>, transform_indices = @transform_4, window_bounds = array<i64: 1, 256>}, {pipeline_mode = #tpu.pipeline_mode<synchronous>, transform_indices = @transform_5, window_bounds = array<i64: 16, 1>}, {pipeline_mode = #tpu.pipeline_mode<synchronous>, transform_indices = @transform_6, window_bounds = array<i64: 16, 1>}, {transform_indices = @transform_7, window_bounds = array<i64: 1, 16, 256>}]} {
    %c0 = arith.constant 0 : index
    %c0_0 = arith.constant 0 : index
    %c0_1 = arith.constant 0 : index
    %0 = vector.load %arg1[%c0, %c0_0, %c0_1] : memref<1x16x128xf32, #tpu.memory_space<vmem>>, vector<1x16x128xf32>
    %1 = vector.shape_cast %0 : vector<1x16x128xf32> to vector<16x128xf32>
    %c1_i32 = arith.constant 1 : i32
    %2 = tpu.dynamic_rotate %1 by %c1_i32 dim 0 : vector<16x128xf32>, i32 -> vector<16x128xf32>
    %c15_i32 = arith.constant 15 : i32
    %3 = tpu.dynamic_rotate %1 by %c15_i32 dim 0 : vector<16x128xf32>, i32 -> vector<16x128xf32>
    %4 = arith.truncf %1 : vector<16x128xf32> to vector<16x128xbf16>
    %c1 = arith.constant 1 : index
    %c0_2 = arith.constant 0 : index
    %c0_3 = arith.constant 0 : index
    %5 = vector.load %arg2[%c1, %c0_2, %c0_3] : memref<3x128x128xbf16, #tpu.memory_space<vmem>>, vector<1x128x128xbf16>
    %6 = vector.shape_cast %5 : vector<1x128x128xbf16> to vector<128x128xbf16>
    %cst = arith.constant dense<0.000000e+00> : vector<16x128xf32>
    %7 = tpu.matmul %4, %6, %cst {dimension_numbers = #tpu.dot_dimension_numbers<[1], [0], [0], [1], [0, 0, 1, 1], [], []>} : vector<16x128xbf16>, vector<128x128xbf16>, vector<16x128xf32> -> vector<16x128xf32>
    %c0_4 = arith.constant 0 : index
    %c0_5 = arith.constant 0 : index
    %8 = vector.load %arg6[%c0_4, %c0_5] : memref<16x1xf32, #tpu.memory_space<vmem>>, vector<16x1xf32>
    %9 = arith.truncf %2 : vector<16x128xf32> to vector<16x128xbf16>
    %c0_6 = arith.constant 0 : index
    %c0_7 = arith.constant 0 : index
    %c0_8 = arith.constant 0 : index
    %10 = vector.load %arg2[%c0_6, %c0_7, %c0_8] : memref<3x128x128xbf16, #tpu.memory_space<vmem>>, vector<1x128x128xbf16>
    %11 = vector.shape_cast %10 : vector<1x128x128xbf16> to vector<128x128xbf16>
    %cst_9 = arith.constant dense<0.000000e+00> : vector<16x128xf32>
    %12 = tpu.matmul %9, %11, %cst_9 {dimension_numbers = #tpu.dot_dimension_numbers<[1], [0], [0], [1], [0, 0, 1, 1], [], []>} : vector<16x128xbf16>, vector<128x128xbf16>, vector<16x128xf32> -> vector<16x128xf32>
    %13 = vector.broadcast %8 : vector<16x1xf32> to vector<16x128xf32>
    %14 = arith.mulf %13, %12 : vector<16x128xf32>
    %15 = arith.addf %7, %14 : vector<16x128xf32>
    %c0_10 = arith.constant 0 : index
    %c0_11 = arith.constant 0 : index
    %16 = vector.load %arg7[%c0_10, %c0_11] : memref<16x1xf32, #tpu.memory_space<vmem>>, vector<16x1xf32>
    %17 = arith.truncf %3 : vector<16x128xf32> to vector<16x128xbf16>
    %c2 = arith.constant 2 : index
    %c0_12 = arith.constant 0 : index
    %c0_13 = arith.constant 0 : index
    %18 = vector.load %arg2[%c2, %c0_12, %c0_13] : memref<3x128x128xbf16, #tpu.memory_space<vmem>>, vector<1x128x128xbf16>
    %19 = vector.shape_cast %18 : vector<1x128x128xbf16> to vector<128x128xbf16>
    %cst_14 = arith.constant dense<0.000000e+00> : vector<16x128xf32>
    %20 = tpu.matmul %17, %19, %cst_14 {dimension_numbers = #tpu.dot_dimension_numbers<[1], [0], [0], [1], [0, 0, 1, 1], [], []>} : vector<16x128xbf16>, vector<128x128xbf16>, vector<16x128xf32> -> vector<16x128xf32>
    %21 = vector.broadcast %16 : vector<16x1xf32> to vector<16x128xf32>
    %22 = arith.mulf %21, %20 : vector<16x128xf32>
    %23 = arith.addf %15, %22 : vector<16x128xf32>
    %c0_15 = arith.constant 0 : index
    %c0_16 = arith.constant 0 : index
    %24 = vector.load %arg3[%c0_15, %c0_16] : memref<1x128xf32, #tpu.memory_space<vmem>>, vector<1x128xf32>
    %25 = vector.broadcast %24 : vector<1x128xf32> to vector<16x128xf32>
    %26 = arith.addf %23, %25 : vector<16x128xf32>
    %cst_17 = arith.constant 0.000000e+00 : f32
    %27 = vector.broadcast %cst_17 : f32 to vector<16x128xf32>
    %28 = arith.maximumf %26, %27 : vector<16x128xf32>
    %29 = arith.truncf %28 : vector<16x128xf32> to vector<16x128xbf16>
    %c0_18 = arith.constant 0 : index
    %c0_19 = arith.constant 0 : index
    %30 = vector.load %arg4[%c0_18, %c0_19] : memref<128x256xbf16, #tpu.memory_space<vmem>>, vector<128x256xbf16>
    %cst_20 = arith.constant dense<0.000000e+00> : vector<16x256xf32>
    %31 = tpu.matmul %29, %30, %cst_20 {dimension_numbers = #tpu.dot_dimension_numbers<[1], [0], [0], [1], [0, 0, 1, 1], [], []>} : vector<16x128xbf16>, vector<128x256xbf16>, vector<16x256xf32> -> vector<16x256xf32>
    %c0_21 = arith.constant 0 : index
    %c0_22 = arith.constant 0 : index
    %32 = vector.load %arg5[%c0_21, %c0_22] : memref<1x256xf32, #tpu.memory_space<vmem>>, vector<1x256xf32>
    %33 = vector.broadcast %32 : vector<1x256xf32> to vector<16x256xf32>
    %34 = arith.addf %31, %33 : vector<16x256xf32>
    %cst_23 = arith.constant 0.000000e+00 : f32
    %35 = vector.broadcast %cst_23 : f32 to vector<16x256xf32>
    %36 = arith.maximumf %34, %35 : vector<16x256xf32>
    %37 = vector.shape_cast %36 : vector<16x256xf32> to vector<1x16x256xf32>
    %c0_24 = arith.constant 0 : index
    %c0_25 = arith.constant 0 : index
    %c0_26 = arith.constant 0 : index
    %38 = vector.load %arg8[%c0_24, %c0_25, %c0_26] : memref<1x16x256xf32, #tpu.memory_space<vmem>>, vector<1x16x256xf32>
    tpu.vector_store %arg8[%c0_24, %c0_25, %c0_26], %37 {strides = array<i32>} : memref<1x16x256xf32, #tpu.memory_space<vmem>>, vector<1x16x256xf32>,
    return
  }
  func.func @transform_0(%arg0: i32) -> (i32, i32, i32) {
    %c0_i32 = arith.constant 0 : i32
    %c0_i32_0 = arith.constant 0 : i32
    %c0_i32_1 = arith.constant 0 : i32
    return %arg0, %c0_i32, %c0_i32_0 : i32, i32, i32
  }
  func.func @transform_1(%arg0: i32) -> (i32, i32, i32) {
    %c0_i32 = arith.constant 0 : i32
    %c0_i32_0 = arith.constant 0 : i32
    %c0_i32_1 = arith.constant 0 : i32
    %c0_i32_2 = arith.constant 0 : i32
    return %c0_i32, %c0_i32_0, %c0_i32_1 : i32, i32, i32
  }
  func.func @transform_2(%arg0: i32) -> (i32, i32) {
    %c0_i32 = arith.constant 0 : i32
    %c0_i32_0 = arith.constant 0 : i32
    %c0_i32_1 = arith.constant 0 : i32
    return %c0_i32, %c0_i32_0 : i32, i32
  }
  func.func @transform_3(%arg0: i32) -> (i32, i32) {
    %c0_i32 = arith.constant 0 : i32
    %c0_i32_0 = arith.constant 0 : i32
    %c0_i32_1 = arith.constant 0 : i32
    return %c0_i32, %c0_i32_0 : i32, i32
  }
  func.func @transform_4(%arg0: i32) -> (i32, i32) {
    %c0_i32 = arith.constant 0 : i32
    %c0_i32_0 = arith.constant 0 : i32
    %c0_i32_1 = arith.constant 0 : i32
    return %c0_i32, %c0_i32_0 : i32, i32
  }
  func.func @transform_5(%arg0: i32) -> (i32, i32) {
    %c0_i32 = arith.constant 0 : i32
    %c0_i32_0 = arith.constant 0 : i32
    %c0_i32_1 = arith.constant 0 : i32
    return %c0_i32, %c0_i32_0 : i32, i32
  }
  func.func @transform_6(%arg0: i32) -> (i32, i32) {
    %c0_i32 = arith.constant 0 : i32
    %c0_i32_0 = arith.constant 0 : i32
    %c0_i32_1 = arith.constant 0 : i32
    return %c0_i32, %c0_i32_0 : i32, i32
  }
  func.func @transform_7(%arg0: i32) -> (i32, i32, i32) {
    %c0_i32 = arith.constant 0 : i32
    %c0_i32_0 = arith.constant 0 : i32
    %c0_i32_1 = arith.constant 0 : i32
    return %arg0, %c0_i32, %c0_i32_0 : i32, i32, i32
  }
}

</mosaic_0001>

<bundles_post_ra>
// kernel: tile.23
= control target key start
LH: loop header
LB: loop body
LE: loop exit
PB: predicated region body
PF: predicated region fallthrough
CT: control target
= control target key end

     0   :  { %s28_s0 = inlined_call_operand.vmem [shape: f32[8], index: 0, kind: input, shape index: {}]   ;;  %s29_s1 = inlined_call_operand.vmem [shape: f32[16,8], index: 1, kind: output, shape index: {}]  }
   0x1   :  { %v4_v0 = vld [vmem:[%s28_s0] ss:$0 sm:$0xff] }
   0x2   :  { %5 = vst [vmem:[%s29_s1] sm:$0xff] %v4_v0  ;;  %8 = vst [vmem:[%s29_s1 + $0x8] sm:$0xff] %v4_v0 }

// kernel: mul.17
= control target key start
LH: loop header
LB: loop body
LE: loop exit
PB: predicated region body
PF: predicated region fallthrough
CT: control target
= control target key end

     0   :  { %s131_s10 = smov 120   ;;  %s132_s11 = smov 104   ;;  %vm3_vm0 = vcmask 64512   ;;  %vm9_vm1 = vcmask 1048512   ;;  %vm15_vm2 = vcmask 982912   ;;  %vm21_vm3 = vcmask 917312   ;;  %s207_s0 = inlined_call_operand.vmem [shape: f32[16,8], index: 0, kind: input, shape index: {}]   ;;  %s208_s1 = inlined_call_operand.vmem [shape: f32[128], index: 1, kind: output, shape index: {}]  }
   0x1   :  { %v101_v0 = vld [vmem:[%s207_s0 + $0xf] sm:$0x1]   ;;  %v103_v1 = vld [vmem:[%s207_s0 + $0xd] sm:$0x1]   ;;  %v102_v2 = vld [vmem:[%s207_s0 + $0xe] sm:$0x1]  }
   0x2   :  { %7 = vrot.lane.b32.xlu0 %v101_v0, %s131_s10  ;;  %19 = vrot.lane.b32.xlu1 %v103_v1, %s132_s11  ;;  %v104_v3 = vld [vmem:[%s207_s0 + $0xc] sm:$0x1]   ;;  %s133_s16 = smov 112   ;;  %s134_s17 = smov 96   ;;  %v105_v4 = vld [vmem:[%s207_s0 + $0xb] sm:$0x1]  }
   0x3   :  { %v106_v5 = vld [vmem:[%s207_s0 + $0xa] sm:$0x1]   ;;  %v2_v6 = vld [vmem:[%s207_s0] sm:$0x1]   ;;  %s135_s24 = smov 88   ;;  %s136_s25 = smov 80  }
   0x4   :  { %4 = vst.msk [vmem:[#allocation0] sm:$0x1] %vm3_vm0, %v2_v6   ;;  %v107_v7 = vld [vmem:[%s207_s0 + $0x9] sm:$0x1]   ;;  %v108_v8 = vld [vmem:[%s207_s0 + $0x8] sm:$0x1]  }
   0x5   :  { %s137_s30 = smov 72   ;;  %s138_s2 = smov 64   ;;  %v109_v9 = vld [vmem:[%s207_s0 + $0x7] sm:$0x1]   ;;  %v110_v10 = vld [vmem:[%s207_s0 + $0x6] sm:$0x1]  }
   0x6   :  { %13 = vrot.lane.b32.xlu0 %v102_v2, %s133_s16  ;;  %25 = vrot.lane.b32.xlu1 %v104_v3, %s134_s17  ;;  %s139_s7 = smov 56   ;;  %s140_s8 = smov 48   ;;  %v111_v11 = vld [vmem:[%s207_s0 + $0x5] sm:$0x1]   ;;  %v112_v12 = vld [vmem:[%s207_s0 + $0x4] sm:$0x1]  }
   0x7   :  { %s141_s13 = smov 40   ;;  %s142_s14 = smov 32   ;;  %v113_v13 = vld [vmem:[%s207_s0 + $0x3] sm:$0x1]   ;;  %v114_v14 = vld [vmem:[%s207_s0 + $0x2] sm:$0x1]  }
   0x8   :  { %s143_s19 = smov 24   ;;  %s144_s20 = smov 16   ;;  %v115_v15 = vld [vmem:[%s207_s0 + $0x1] sm:$0x1]   ;;  %vm27_vm4 = vcmask 851712   ;;  %vm33_vm5 = vcmask 786112  }
   0x9   :  { %s145_s0 = smov 8   ;;  %vm39_vm6 = vcmask 720512   ;;  %vm45_vm7 = vcmask 654912   ;;  %vm51_vm8 = vcmask 589312   ;;  %vm57_vm9 = vcmask 523712  }
   0xa   :  { %31 = vrot.lane.b32.xlu0 %v105_v4, %s135_s24  ;;  %37 = vrot.lane.b32.xlu1 %v106_v5, %s136_s25  ;;  %vm63_vm10 = vcmask 458112   ;;  %vm69_vm11 = vcmask 392512   ;;  %vm75_vm12 = vcmask 326912   ;;  %vm81_vm13 = vcmask 261312  }
   0xb   :  { %vm87_vm14 = vcmask 195712   ;;  %vm93_vm15 = vcmask 130112  }
   0xe   :  { %43 = vrot.lane.b32.xlu0 %v107_v7, %s137_s30  ;;  %49 = vrot.lane.b32.xlu1 %v108_v8, %s138_s2 }
  0x12   :  { %55 = vrot.lane.b32.xlu0 %v109_v9, %s139_s7  ;;  %61 = vrot.lane.b32.xlu1 %v110_v10, %s140_s8 }
  0x16   :  { %67 = vrot.lane.b32.xlu0 %v111_v11, %s141_s13  ;;  %73 = vrot.lane.b32.xlu1 %v112_v12, %s142_s14 }
  0x1a   :  { %79 = vrot.lane.b32.xlu0 %v113_v13, %s143_s19  ;;  %85 = vrot.lane.b32.xlu1 %v114_v14, %s144_s20 }
  0x1e   :  { %91 = vrot.lane.b32.xlu0 %v115_v15, %s145_s0 }
  0x74   :  { %v8_v16 = vpop.permute.xlu0 %7   ;;  %v20_v17 = vpop.permute.xlu1 %19  }
  0x75   :  { %10 = vst.msk [vmem:[#allocation0] sm:$0x1] %vm9_vm1, %v8_v16  }
  0x78   :  { %v14_v18 = vpop.permute.xlu0 %13   ;;  %v26_v19 = vpop.permute.xlu1 %25  }
  0x79   :  { %16 = vst.msk [vmem:[#allocation0] sm:$0x1] %vm15_vm2, %v14_v18  }
  0x7a   :  { %22 = vst.msk [vmem:[#allocation0] sm:$0x1] %vm21_vm3, %v20_v17  }
  0x7b   :  { %28 = vst.msk [vmem:[#allocation0] sm:$0x1] %vm27_vm4, %v26_v19  }
  0x7c   :  { %v32_v20 = vpop.permute.xlu0 %31   ;;  %v38_v21 = vpop.permute.xlu1 %37  }
  0x7d   :  { %34 = vst.msk [vmem:[#allocation0] sm:$0x1] %vm33_vm5, %v32_v20  }
  0x7e   :  { %40 = vst.msk [vmem:[#allocation0] sm:$0x1] %vm39_vm6, %v38_v21  }
  0x80   :  { %v44_v22 = vpop.permute.xlu0 %43   ;;  %v50_v23 = vpop.permute.xlu1 %49  }
  0x81   :  { %46 = vst.msk [vmem:[#allocation0] sm:$0x1] %vm45_vm7, %v44_v22  }
  0x82   :  { %52 = vst.msk [vmem:[#allocation0] sm:$0x1] %vm51_vm8, %v50_v23  }
  0x84   :  { %v56_v24 = vpop.permute.xlu0 %55   ;;  %v62_v25 = vpop.permute.xlu1 %61  }
  0x85   :  { %58 = vst.msk [vmem:[#allocation0] sm:$0x1] %vm57_vm9, %v56_v24  }
  0x86   :  { %64 = vst.msk [vmem:[#allocation0] sm:$0x1] %vm63_vm10, %v62_v25  }
  0x88   :  { %v68_v26 = vpop.permute.xlu0 %67   ;;  %v74_v27 = vpop.permute.xlu1 %73  }
  0x89   :  { %70 = vst.msk [vmem:[#allocation0] sm:$0x1] %vm69_vm11, %v68_v26  }
  0x8a   :  { %76 = vst.msk [vmem:[#allocation0] sm:$0x1] %vm75_vm12, %v74_v27  }
  0x8c   :  { %v80_v28 = vpop.permute.xlu0 %79   ;;  %v86_v29 = vpop.permute.xlu1 %85  }
  0x8d   :  { %82 = vst.msk [vmem:[#allocation0] sm:$0x1] %vm81_vm13, %v80_v28  }
  0x8e   :  { %88 = vst.msk [vmem:[#allocation0] sm:$0x1] %vm87_vm14, %v86_v29  }
  0x90   :  { %v92_v30 = vpop.permute.xlu0 %91  }
  0x91   :  { %94 = vst.msk [vmem:[#allocation0] sm:$0x1] %vm93_vm15, %v92_v30  }
  0x98   :  { %v98_v31 = vld [vmem:[#allocation0] sm:$0x1] }
  0x99   :  { %100 = vst [vmem:[%s208_s1] sm:$0x1] %v98_v31 }

// kernel: tile.28
= control target key start
LH: loop header
LB: loop body
LE: loop exit
PB: predicated region body
PF: predicated region fallthrough
CT: control target
= control target key end

     0   :  { %s28_s0 = inlined_call_operand.vmem [shape: f32[16], index: 0, kind: input, shape index: {}]   ;;  %s29_s1 = inlined_call_operand.vmem [shape: f32[16,16], index: 1, kind: output, shape index: {}]  }
   0x1   :  { %v4_v0 = vld [vmem:[%s28_s0] ss:$0 sm:$0xff] }
   0x2   :  { %5 = vst [vmem:[%s29_s1] sm:$0xff] %v4_v0  ;;  %8 = vst [vmem:[%s29_s1 + $0x8] sm:$0xff] %v4_v0 }

// kernel: mul.21
= control target key start
LH: loop header
LB: loop body
LE: loop exit
PB: predicated region body
PF: predicated region fallthrough
CT: control target
= control target key end

     0   :  { %s7_s6 = smov 3  ;;  %s21_s9 = smov 3  ;;  %vm4_vm0 = vcmask 130048   ;;  %vm11_vm1 = vcmask 1048448   ;;  %vm18_vm2 = vcmask 917248   ;;  %vm25_vm3 = vcmask 786048   ;;  %s119_s0 = inlined_call_operand.vmem [shape: f32[16,16], index: 0, kind: input, shape index: {}]   ;;  %s120_s1 = inlined_call_operand.vmem [shape: f32[256], index: 1, kind: output, shape index: {}]  }
   0x1   :  { %v61_v0 = vld [vmem:[%s119_s0 + $0x7] ss:$8 sm:%s7_s6]   ;;  %s75_s10 = smov 112   ;;  %v63_v1 = vld [vmem:[%s119_s0 + $0x5] ss:$8 sm:%s21_s9]   ;;  %s14_s13 = smov 3 }
   0x2   :  { %9 = vrot.lane.b32.xlu0 %v61_v0, %s75_s10  ;;  %s76_s14 = smov 80   ;;  %v62_v2 = vld [vmem:[%s119_s0 + $0x6] ss:$8 sm:%s14_s13]   ;;  %s28_s17 = smov 3  ;;  %vm32_vm4 = vcmask 654848   ;;  %vm39_vm5 = vcmask 523648  }
   0x3   :  { %23 = vrot.lane.b32.xlu1 %v63_v1, %s76_s14  ;;  %v64_v3 = vld [vmem:[%s119_s0 + $0x4] ss:$8 sm:%s28_s17]   ;;  %s35_s20 = smov 3  ;;  %s42_s21 = smov 3  ;;  %vm46_vm6 = vcmask 392448   ;;  %vm53_vm7 = vcmask 261248  }
   0x4   :  { %s77_s22 = smov 96   ;;  %s78_s23 = smov 64   ;;  %v65_v4 = vld [vmem:[%s119_s0 + $0x3] ss:$8 sm:%s35_s20]   ;;  %v66_v5 = vld [vmem:[%s119_s0 + $0x2] ss:$8 sm:%s42_s21]  }
   0x5   :  { %s2_s26 = smov 3  ;;  %s49_s29 = smov 3 }
   0x6   :  { %16 = vrot.lane.b32.xlu0 %v62_v2, %s77_s22  ;;  %v3_v6 = vld [vmem:[%s119_s0] ss:$8 sm:%s2_s26]   ;;  %s79_s3 = smov 48   ;;  %s80_s4 = smov 32  }
   0x7   :  { %30 = vrot.lane.b32.xlu1 %v64_v3, %s78_s23  ;;  %5 = vst.msk [vmem:[#allocation0] sm:$0x3] %vm4_vm0, %v3_v6   ;;  %v67_v7 = vld [vmem:[%s119_s0 + $0x1] ss:$8 sm:%s49_s29]   ;;  %s81_s0 = smov 16  }
   0xa   :  { %37 = vrot.lane.b32.xlu0 %v65_v4, %s79_s3 }
   0xb   :  { %44 = vrot.lane.b32.xlu1 %v66_v5, %s80_s4 }
   0xe   :  { %51 = vrot.lane.b32.xlu0 %v67_v7, %s81_s0 }
  0x74   :  { %v10_v8 = vpop.permute.xlu0 %9  }
  0x75   :  { %12 = vst.msk [vmem:[#allocation0] sm:$0x3] %vm11_vm1, %v10_v8   ;;  %v24_v9 = vpop.permute.xlu1 %23  }
  0x78   :  { %v17_v10 = vpop.permute.xlu0 %16  }
  0x79   :  { %19 = vst.msk [vmem:[#allocation0] sm:$0x3] %vm18_vm2, %v17_v10   ;;  %v31_v11 = vpop.permute.xlu1 %30  }
  0x7a   :  { %26 = vst.msk [vmem:[#allocation0] sm:$0x3] %vm25_vm3, %v24_v9  }
  0x7b   :  { %33 = vst.msk [vmem:[#allocation0] sm:$0x3] %vm32_vm4, %v31_v11  }
  0x7c   :  { %v38_v12 = vpop.permute.xlu0 %37  }
  0x7d   :  { %40 = vst.msk [vmem:[#allocation0] sm:$0x3] %vm39_vm5, %v38_v12   ;;  %v45_v13 = vpop.permute.xlu1 %44  }
  0x7e   :  { %47 = vst.msk [vmem:[#allocation0] sm:$0x3] %vm46_vm6, %v45_v13  }
  0x80   :  { %v52_v14 = vpop.permute.xlu0 %51  }
  0x81   :  { %54 = vst.msk [vmem:[#allocation0] sm:$0x3] %vm53_vm7, %v52_v14  }
  0x88   :  { %v58_v15 = vld [vmem:[#allocation0] sm:$0x3] }
  0x89   :  { %60 = vst [vmem:[%s120_s1] sm:$0x3] %v58_v15 }

// kernel: tile.39
= control target key start
LH: loop header
LB: loop body
LE: loop exit
PB: predicated region body
PF: predicated region fallthrough
CT: control target
= control target key end

     0   :  { %s7_s6 = smov 3  ;;  %s21_s9 = smov 3  ;;  %vm4_vm0 = vcmask 130048   ;;  %vm11_vm1 = vcmask 1048448   ;;  %vm18_vm2 = vcmask 917248   ;;  %vm25_vm3 = vcmask 786048   ;;  %s128_s0 = inlined_call_operand.vmem [shape: f32[16,16], index: 0, kind: input, shape index: {}]   ;;  %s129_s1 = inlined_call_operand.vmem [shape: f32[1,256], index: 1, kind: output, shape index: {}]  }
   0x1   :  { %v66_v0 = vld [vmem:[%s128_s0 + $0x7] ss:$8 sm:%s7_s6]   ;;  %s81_s10 = smov 112   ;;  %v68_v1 = vld [vmem:[%s128_s0 + $0x5] ss:$8 sm:%s21_s9]   ;;  %s14_s13 = smov 3 }
   0x2   :  { %9 = vrot.lane.b32.xlu0 %v66_v0, %s81_s10  ;;  %s82_s14 = smov 80   ;;  %v67_v2 = vld [vmem:[%s128_s0 + $0x6] ss:$8 sm:%s14_s13]   ;;  %s28_s17 = smov 3  ;;  %vm32_vm4 = vcmask 654848   ;;  %vm39_vm5 = vcmask 523648  }
   0x3   :  { %23 = vrot.lane.b32.xlu1 %v68_v1, %s82_s14  ;;  %v69_v3 = vld [vmem:[%s128_s0 + $0x4] ss:$8 sm:%s28_s17]   ;;  %s35_s20 = smov 3  ;;  %s42_s21 = smov 3  ;;  %vm46_vm6 = vcmask 392448   ;;  %vm53_vm7 = vcmask 261248  }
   0x4   :  { %s83_s22 = smov 96   ;;  %s84_s23 = smov 64   ;;  %v70_v4 = vld [vmem:[%s128_s0 + $0x3] ss:$8 sm:%s35_s20]   ;;  %v71_v5 = vld [vmem:[%s128_s0 + $0x2] ss:$8 sm:%s42_s21]  }
   0x5   :  { %s2_s26 = smov 3  ;;  %s49_s29 = smov 3 }
   0x6   :  { %16 = vrot.lane.b32.xlu0 %v67_v2, %s83_s22  ;;  %v3_v6 = vld [vmem:[%s128_s0] ss:$8 sm:%s2_s26]   ;;  %s85_s3 = smov 48   ;;  %s86_s4 = smov 32  }
   0x7   :  { %30 = vrot.lane.b32.xlu1 %v69_v3, %s84_s23  ;;  %5 = vst.msk [vmem:[#allocation0] ss:$8 sm:$0x3] %vm4_vm0, %v3_v6   ;;  %v72_v7 = vld [vmem:[%s128_s0 + $0x1] ss:$8 sm:%s49_s29]   ;;  %s87_s0 = smov 16  }
   0xa   :  { %37 = vrot.lane.b32.xlu0 %v70_v4, %s85_s3 }
   0xb   :  { %44 = vrot.lane.b32.xlu1 %v71_v5, %s86_s4 }
   0xe   :  { %51 = vrot.lane.b32.xlu0 %v72_v7, %s87_s0 }
  0x74   :  { %v10_v8 = vpop.permute.xlu0 %9  }
  0x75   :  { %12 = vst.msk [vmem:[#allocation0] ss:$8 sm:$0x3] %vm11_vm1, %v10_v8   ;;  %v24_v9 = vpop.permute.xlu1 %23  }
  0x78   :  { %v17_v10 = vpop.permute.xlu0 %16  }
  0x79   :  { %19 = vst.msk [vmem:[#allocation0] ss:$8 sm:$0x3] %vm18_vm2, %v17_v10   ;;  %v31_v11 = vpop.permute.xlu1 %30  }
  0x7a   :  { %26 = vst.msk [vmem:[#allocation0] ss:$8 sm:$0x3] %vm25_vm3, %v24_v9  }
  0x7b   :  { %33 = vst.msk [vmem:[#allocation0] ss:$8 sm:$0x3] %vm32_vm4, %v31_v11  }
  0x7c   :  { %v38_v12 = vpop.permute.xlu0 %37  }
  0x7d   :  { %40 = vst.msk [vmem:[#allocation0] ss:$8 sm:$0x3] %vm39_vm5, %v38_v12   ;;  %v45_v13 = vpop.permute.xlu1 %44  }
  0x7e   :  { %47 = vst.msk [vmem:[#allocation0] ss:$8 sm:$0x3] %vm46_vm6, %v45_v13  }
  0x80   :  { %v52_v14 = vpop.permute.xlu0 %51  }
  0x81   :  { %54 = vst.msk [vmem:[#allocation0] ss:$8 sm:$0x3] %vm53_vm7, %v52_v14  }
  0x88   :  { %v58_v15 = vld [vmem:[#allocation0] sm:$0x1]  ;;  %v62_v16 = vld [vmem:[#allocation0 + $0x8] sm:$0x1] }
  0x89   :  { %60 = vst [vmem:[%s129_s1] sm:$0x1] %v58_v15  ;;  %73 = vst [vmem:[%s129_s1 + $0x1] sm:$0x1] %v62_v16 }

// kernel: tile.34
= control target key start
LH: loop header
LB: loop body
LE: loop exit
PB: predicated region body
PF: predicated region fallthrough
CT: control target
= control target key end

     0   :  { %s131_s10 = smov 120   ;;  %s132_s11 = smov 104   ;;  %vm3_vm0 = vcmask 64512   ;;  %vm9_vm1 = vcmask 1048512   ;;  %vm15_vm2 = vcmask 982912   ;;  %vm21_vm3 = vcmask 917312   ;;  %s207_s0 = inlined_call_operand.vmem [shape: f32[16,8], index: 0, kind: input, shape index: {}]   ;;  %s208_s1 = inlined_call_operand.vmem [shape: f32[1,128], index: 1, kind: output, shape index: {}]  }
   0x1   :  { %v101_v0 = vld [vmem:[%s207_s0 + $0xf] sm:$0x1]   ;;  %v103_v1 = vld [vmem:[%s207_s0 + $0xd] sm:$0x1]   ;;  %v102_v2 = vld [vmem:[%s207_s0 + $0xe] sm:$0x1]  }
   0x2   :  { %7 = vrot.lane.b32.xlu0 %v101_v0, %s131_s10  ;;  %19 = vrot.lane.b32.xlu1 %v103_v1, %s132_s11  ;;  %v104_v3 = vld [vmem:[%s207_s0 + $0xc] sm:$0x1]   ;;  %s133_s16 = smov 112   ;;  %s134_s17 = smov 96   ;;  %v105_v4 = vld [vmem:[%s207_s0 + $0xb] sm:$0x1]  }
   0x3   :  { %v106_v5 = vld [vmem:[%s207_s0 + $0xa] sm:$0x1]   ;;  %v2_v6 = vld [vmem:[%s207_s0] sm:$0x1]   ;;  %s135_s24 = smov 88   ;;  %s136_s25 = smov 80  }
   0x4   :  { %4 = vst.msk [vmem:[#allocation0] sm:$0x1] %vm3_vm0, %v2_v6   ;;  %v107_v7 = vld [vmem:[%s207_s0 + $0x9] sm:$0x1]   ;;  %v108_v8 = vld [vmem:[%s207_s0 + $0x8] sm:$0x1]  }
   0x5   :  { %s137_s30 = smov 72   ;;  %s138_s2 = smov 64   ;;  %v109_v9 = vld [vmem:[%s207_s0 + $0x7] sm:$0x1]   ;;  %v110_v10 = vld [vmem:[%s207_s0 + $0x6] sm:$0x1]  }
   0x6   :  { %13 = vrot.lane.b32.xlu0 %v102_v2, %s133_s16  ;;  %25 = vrot.lane.b32.xlu1 %v104_v3, %s134_s17  ;;  %s139_s7 = smov 56   ;;  %s140_s8 = smov 48   ;;  %v111_v11 = vld [vmem:[%s207_s0 + $0x5] sm:$0x1]   ;;  %v112_v12 = vld [vmem:[%s207_s0 + $0x4] sm:$0x1]  }
   0x7   :  { %s141_s13 = smov 40   ;;  %s142_s14 = smov 32   ;;  %v113_v13 = vld [vmem:[%s207_s0 + $0x3] sm:$0x1]   ;;  %v114_v14 = vld [vmem:[%s207_s0 + $0x2] sm:$0x1]  }
   0x8   :  { %s143_s19 = smov 24   ;;  %s144_s20 = smov 16   ;;  %v115_v15 = vld [vmem:[%s207_s0 + $0x1] sm:$0x1]   ;;  %vm27_vm4 = vcmask 851712   ;;  %vm33_vm5 = vcmask 786112  }
   0x9   :  { %s145_s0 = smov 8   ;;  %vm39_vm6 = vcmask 720512   ;;  %vm45_vm7 = vcmask 654912   ;;  %vm51_vm8 = vcmask 589312   ;;  %vm57_vm9 = vcmask 523712  }
   0xa   :  { %31 = vrot.lane.b32.xlu0 %v105_v4, %s135_s24  ;;  %37 = vrot.lane.b32.xlu1 %v106_v5, %s136_s25  ;;  %vm63_vm10 = vcmask 458112   ;;  %vm69_vm11 = vcmask 392512   ;;  %vm75_vm12 = vcmask 326912   ;;  %vm81_vm13 = vcmask 261312  }
   0xb   :  { %vm87_vm14 = vcmask 195712   ;;  %vm93_vm15 = vcmask 130112  }
   0xe   :  { %43 = vrot.lane.b32.xlu0 %v107_v7, %s137_s30  ;;  %49 = vrot.lane.b32.xlu1 %v108_v8, %s138_s2 }
  0x12   :  { %55 = vrot.lane.b32.xlu0 %v109_v9, %s139_s7  ;;  %61 = vrot.lane.b32.xlu1 %v110_v10, %s140_s8 }
  0x16   :  { %67 = vrot.lane.b32.xlu0 %v111_v11, %s141_s13  ;;  %73 = vrot.lane.b32.xlu1 %v112_v12, %s142_s14 }
  0x1a   :  { %79 = vrot.lane.b32.xlu0 %v113_v13, %s143_s19  ;;  %85 = vrot.lane.b32.xlu1 %v114_v14, %s144_s20 }
  0x1e   :  { %91 = vrot.lane.b32.xlu0 %v115_v15, %s145_s0 }
  0x74   :  { %v8_v16 = vpop.permute.xlu0 %7   ;;  %v20_v17 = vpop.permute.xlu1 %19  }
  0x75   :  { %10 = vst.msk [vmem:[#allocation0] sm:$0x1] %vm9_vm1, %v8_v16  }
  0x78   :  { %v14_v18 = vpop.permute.xlu0 %13   ;;  %v26_v19 = vpop.permute.xlu1 %25  }
  0x79   :  { %16 = vst.msk [vmem:[#allocation0] sm:$0x1] %vm15_vm2, %v14_v18  }
  0x7a   :  { %22 = vst.msk [vmem:[#allocation0] sm:$0x1] %vm21_vm3, %v20_v17  }
  0x7b   :  { %28 = vst.msk [vmem:[#allocation0] sm:$0x1] %vm27_vm4, %v26_v19  }
  0x7c   :  { %v32_v20 = vpop.permute.xlu0 %31   ;;  %v38_v21 = vpop.permute.xlu1 %37  }
  0x7d   :  { %34 = vst.msk [vmem:[#allocation0] sm:$0x1] %vm33_vm5, %v32_v20  }
  0x7e   :  { %40 = vst.msk [vmem:[#allocation0] sm:$0x1] %vm39_vm6, %v38_v21  }
  0x80   :  { %v44_v22 = vpop.permute.xlu0 %43   ;;  %v50_v23 = vpop.permute.xlu1 %49  }
  0x81   :  { %46 = vst.msk [vmem:[#allocation0] sm:$0x1] %vm45_vm7, %v44_v22  }
  0x82   :  { %52 = vst.msk [vmem:[#allocation0] sm:$0x1] %vm51_vm8, %v50_v23  }
  0x84   :  { %v56_v24 = vpop.permute.xlu0 %55   ;;  %v62_v25 = vpop.permute.xlu1 %61  }
  0x85   :  { %58 = vst.msk [vmem:[#allocation0] sm:$0x1] %vm57_vm9, %v56_v24  }
  0x86   :  { %64 = vst.msk [vmem:[#allocation0] sm:$0x1] %vm63_vm10, %v62_v25  }
  0x88   :  { %v68_v26 = vpop.permute.xlu0 %67   ;;  %v74_v27 = vpop.permute.xlu1 %73  }
  0x89   :  { %70 = vst.msk [vmem:[#allocation0] sm:$0x1] %vm69_vm11, %v68_v26  }
  0x8a   :  { %76 = vst.msk [vmem:[#allocation0] sm:$0x1] %vm75_vm12, %v74_v27  }
  0x8c   :  { %v80_v28 = vpop.permute.xlu0 %79   ;;  %v86_v29 = vpop.permute.xlu1 %85  }
  0x8d   :  { %82 = vst.msk [vmem:[#allocation0] sm:$0x1] %vm81_vm13, %v80_v28  }
  0x8e   :  { %88 = vst.msk [vmem:[#allocation0] sm:$0x1] %vm87_vm14, %v86_v29  }
  0x90   :  { %v92_v30 = vpop.permute.xlu0 %91  }
  0x91   :  { %94 = vst.msk [vmem:[#allocation0] sm:$0x1] %vm93_vm15, %v92_v30  }
  0x98   :  { %v98_v31 = vld [vmem:[#allocation0] sm:$0x1] }
  0x99   :  { %100 = vst [vmem:[%s208_s1] sm:$0x1] %v98_v31 }

// kernel: qblock_forward.1
= control target key start
LH: loop header
LB: loop body
LE: loop exit
PB: predicated region body
PF: predicated region fallthrough
CT: control target
= control target key end

     0   :  { %s1155_s24 = smov 0   ;;  %s1363_s0 = inlined_call_operand.vmem [shape: f32[2,16,128], index: 0, kind: input, shape index: {}]   ;;  %s1364_s1 = inlined_call_operand.vmem [shape: bf16[3,128,128], index: 1, kind: input, shape index: {}]   ;;  %s1365_s2 = inlined_call_operand.vmem [shape: f32[1,128], index: 2, kind: input, shape index: {}]   ;;  %s1366_s3 = inlined_call_operand.vmem [shape: bf16[128,256], index: 3, kind: input, shape index: {}]   ;;  %s1367_s4 = inlined_call_operand.vmem [shape: f32[1,256], index: 4, kind: input, shape index: {}]   ;;  %s1368_s5 = inlined_call_operand.vmem [shape: f32[16,1], index: 5, kind: input, shape index: {}]   ;;  %s1369_s6 = inlined_call_operand.vmem [shape: f32[16,1], index: 6, kind: input, shape index: {}]   ;;  %s1370_s7 = inlined_call_operand.vmem [shape: f32[2,16,256], index: 7, kind: output, shape index: {}]  }
   0x1 LB: > { %s870_s25 = sadd.s32 4294967295, %s1110_s24   ;;  %p874_p0 = scmp.ge.s32.totalorder %s1110_s24, 1  ;;  %s1110_s24 = sphi %s1155_s24, %s17_s24  }
   0x2   : > { %p237_p1 = scmp.lt.s32.totalorder %s1110_s24, 3 }
   0x4   : > { %p238_p2 = pnand %p874_p0, %p237_p1 }
   0x5   : > { %v1056_v0 = vld [vmem:[%s1364_s1] sm:$0xff] (!%p238_p2)   ;;  %v1112_v1 = vmov (!%p238_p2), 0.0   ;;  %v1058_v3 = vld [vmem:[%s1364_s1 + $0x8] sm:$0xff] (!%p238_p2)   ;;  %vm1113_vm0 = vmmov (!%p238_p2), 0   ;;  %p269_p3 = scmp.lt.s32.totalorder (!%p238_p2), %s870_s25, 1  ;;  %v1060_v5 = vld [vmem:[%s1364_s1 + $0x10] sm:$0xff] (!%p238_p2)   ;;  %v284_v12 = vlaneseq (!%p238_p2) }
   0x6   : > { %241 = sbr.rel (%p238_p2) target bundleno = 514 (0x202), region = 48  ;;  %983 = vmatprep.subr.bf16.mxu0 (!%p238_p2), %v1112_v1  ;;  %1003 = vmatprep.subr.bf16.mxu1 (!%p238_p2), %v1112_v1  ;;  %v1057_v2 = vld [vmem:[%s1364_s1 + $0x40] sm:$0xff] (!%p238_p2)   ;;  %v1059_v4 = vld [vmem:[%s1364_s1 + $0x48] sm:$0xff] (!%p238_p2)   ;;  %v1061_v6 = vld [vmem:[%s1364_s1 + $0x50] sm:$0xff] (!%p238_p2)   ;;  %v1114_v7 = vmov (!%p238_p2), 0  }
   0x7   : > { %984 = vmatpush3.bf16.msra.mxu0 (!%p238_p2), %v1056_v0  ;;  %999 = vmatprep.mubr.msk.bf16.mxu0 (!%p238_p2), %vm1113_vm0, %v1112_v1  ;;  %v1062_v8 = vld [vmem:[%s1364_s1 + $0x18] sm:$0xff] (!%p238_p2)   ;;  %v1064_v10 = vld [vmem:[%s1364_s1 + $0x20] sm:$0xff] (!%p238_p2)   ;;  %v1066_v13 = vld [vmem:[%s1364_s1 + $0x28] sm:$0xff] (!%p238_p2)   ;;  %v1226_v17 = vshrl.u32 (!%p238_p2), %v284_v12, 7 }
   0x8   : > { %1004 = vmatpush3.bf16.msra.mxu1 (!%p238_p2), %v1057_v2  ;;  %985 = vmatprep.subr.bf16.mxu0 (!%p238_p2), %v1112_v1  ;;  %v1063_v9 = vld [vmem:[%s1364_s1 + $0x58] sm:$0xff] (!%p238_p2)   ;;  %v1065_v11 = vld [vmem:[%s1364_s1 + $0x60] sm:$0xff] (!%p238_p2)   ;;  %v1067_v14 = vld [vmem:[%s1364_s1 + $0x68] sm:$0xff] (!%p238_p2)  }
   0x9   : > { %1005 = vmatprep.subr.bf16.mxu1 (!%p238_p2), %v1112_v1  ;;  %1019 = vmatprep.mubr.msk.bf16.mxu1 (!%p238_p2), %vm1113_vm0, %v1112_v1  ;;  %v1068_v18 = vld [vmem:[%s1364_s1 + $0x30] sm:$0xff] (!%p238_p2)   ;;  %vm286_vm1 = vcmp.lt.s32.totalorder (!%p238_p2), %v1226_v17, 1  ;;  %v1070_v22 = vld [vmem:[%s1364_s1 + $0x38] sm:$0xff] (!%p238_p2)   ;;  %v312_v23 = vld [vmem:[%s1368_s5] sm:$0xff] (!%p238_p2)  ;;  %vm291_vm2 = vcmp.lt.s32.totalorder (!%p238_p2), %v1226_v17, 7 }
   0xa   : > { %1054 = vset.pattern.permute.xlu0 (!%p238_p2), %v1114_v7  ;;  %1055 = vset.pattern.permute.xlu1 (!%p238_p2), %v1114_v7  ;;  %v1069_v21 = vld [vmem:[%s1364_s1 + $0x70] sm:$0xff] (!%p238_p2)   ;;  %v1071_v24 = vld [vmem:[%s1364_s1 + $0x78] sm:$0xff] (!%p238_p2)   ;;  %v313_v25 = vld [vmem:[%s1368_s5 + $0x8] sm:$0xff] (!%p238_p2) }
   0xb   : > { %986 = vmatpush3.bf16.msra.mxu0 (!%p238_p2), %v1058_v3  ;;  %422 = vperm.xlu0 (!%p238_p2), %1054, %v312_v23   ;;  %v521_v26 = vld [vmem:[%s1369_s6] sm:$0xff] (!%p238_p2)  ;;  %v522_v27 = vld [vmem:[%s1369_s6 + $0x8] sm:$0xff] (!%p238_p2)  ;;  %v1074_v34 = vld [vmem:[%s1364_s1 + $0x90] sm:$0xff] (!%p238_p2)  }
   0xc   : > { %1006 = vmatpush3.bf16.msra.mxu1 (!%p238_p2), %v1059_v4  ;;  %987 = vmatprep.subr.bf16.mxu0 (!%p238_p2), %v1112_v1  ;;  %v1072_v30 = vld [vmem:[%s1364_s1 + $0x80] sm:$0xff] (!%p238_p2)   ;;  %v1073_v33 = vld [vmem:[%s1364_s1 + $0x88] sm:$0xff] (!%p238_p2)   ;;  %v1075_v35 = vld [vmem:[%s1364_s1 + $0x98] sm:$0xff] (!%p238_p2)  }
   0xd   : > { %s1372_s25 = smov (!%p269_p3, %s870_s25), 1  ;;  %1007 = vmatprep.subr.bf16.mxu1 %v1112_v1  ;;  %632 = vperm.xlu1 %1055, %v521_v26   ;;  %v1076_v36 = vld [vmem:[%s1364_s1 + $0xa0] sm:$0xff]   ;;  %v1077_v37 = vld [vmem:[%s1364_s1 + $0xa8] sm:$0xff]   ;;  %v1078_v38 = vld [vmem:[%s1364_s1 + $0xb0] sm:$0xff]  }
   0xe   : > { %s954_s19 = sshll.u32 %s1372_s25, 4  ;;  %v1079_v41 = vld [vmem:[%s1364_s1 + $0xb8] sm:$0xff]   ;;  %v1080_v45 = vld [vmem:[%s1366_s3] ss:$8 sps:$4 sm:$0xff]   ;;  %v1082_v46 = vld [vmem:[%s1366_s3 + $0x4] ss:$8 sps:$4 sm:$0xff]  }
   0xf   : > { %988 = vmatpush3.bf16.msra.mxu0 %v1060_v5  ;;  %s273_s26 = scalar_lea.vmem %s1363_s0, %s954_s19  ;;  %427 = vperm.xlu0 %1054, %v313_v25   ;;  %v1085_v47 = vld [vmem:[%s1366_s3 + $0x14] ss:$8 sps:$4 sm:$0xff]   ;;  %v1083_v48 = vld [vmem:[%s1366_s3 + $0x10] ss:$8 sps:$4 sm:$0xff]   ;;  %v1088_v49 = vld [vmem:[%s1366_s3 + $0x24] ss:$8 sps:$4 sm:$0xff]  }
  0x10   : > { %1008 = vmatpush3.bf16.msra.mxu1 %v1061_v6  ;;  %989 = vmatprep.subr.bf16.mxu0 %v1112_v1  ;;  %v1221_v15 = vld [vmem:[%s273_s26] sm:$0xff]  ;;  %v1224_v16 = vld [vmem:[%s273_s26 + $0x8] sm:$0xff]  ;;  %v1091_v51 = vld [vmem:[%s1366_s3 + $0x34] ss:$8 sps:$4 sm:$0xff]   ;;  %s955_s15 = sshll.u32 %s1372_s25, 5 }
  0x11   : > { %1009 = vmatprep.subr.bf16.mxu1 %v1112_v1  ;;  %v282_v19 = vrot.slane %v1221_v15, 7  ;;  %v283_v20 = vrot.slane %v1224_v16, 7  ;;  %v294_v32 = vpack.c.bf16 %v1224_v16, %v1221_v15  ;;  %637 = vperm.xlu1 %1055, %v522_v27   ;;  %v289_v39 = vrot.slane %v1221_v15, 1  ;;  %v1086_v50 = vld [vmem:[%s1366_s3 + $0x20] ss:$8 sps:$4 sm:$0xff]   ;;  %s278_s18 = scalar_lea.vmem %s1370_s7, %s955_s15 }
  0x12   : > { %v290_v40 = vrot.slane %v1224_v16, 1  ;;  %v1089_v52 = vld [vmem:[%s1366_s3 + $0x30] ss:$8 sps:$4 sm:$0xff]   ;;  %v1094_v53 = vld [vmem:[%s1366_s3 + $0x44] ss:$8 sps:$4 sm:$0xff]  }
  0x13   : > { %990 = vmatpush3.bf16.msra.mxu0 %v1062_v8  ;;  %v287_v28 = vsel %vm286_vm1, %v282_v19, %v283_v20  ;;  %v288_v29 = vsel %vm286_vm1, %v283_v20, %v282_v19  ;;  %v1092_v54 = vld [vmem:[%s1366_s3 + $0x40] ss:$8 sps:$4 sm:$0xff]   ;;  %v1097_v55 = vld [vmem:[%s1366_s3 + $0x54] ss:$8 sps:$4 sm:$0xff]   ;;  %v1095_v56 = vld [vmem:[%s1366_s3 + $0x50] ss:$8 sps:$4 sm:$0xff]  }
  0x14   : > { %1010 = vmatpush3.bf16.msra.mxu1 %v1063_v9  ;;  %991 = vmatprep.subr.bf16.mxu0 %v1112_v1  ;;  %v314_v31 = vpack.c.bf16 %v287_v28, %v288_v29  ;;  %v292_v42 = vsel %vm291_vm2, %v289_v39, %v290_v40  ;;  %v293_v43 = vsel %vm291_vm2, %v290_v40, %v289_v39  ;;  %v1100_v57 = vld [vmem:[%s1366_s3 + $0x64] ss:$8 sps:$4 sm:$0xff]   ;;  %v1098_v58 = vld [vmem:[%s1366_s3 + $0x60] ss:$8 sps:$4 sm:$0xff]   ;;  %v1103_v59 = vld [vmem:[%s1366_s3 + $0x74] ss:$8 sps:$4 sm:$0xff]  }
  0x15   : > { %1011 = vmatprep.subr.bf16.mxu1 %v1112_v1  ;;  %v523_v44 = vpack.c.bf16 %v293_v43, %v292_v42  ;;  %v1101_v60 = vld [vmem:[%s1366_s3 + $0x70] ss:$8 sps:$4 sm:$0xff]   ;;  %v935_v16 = vld [vmem:[%s1365_s2] ss:$0 sm:$0xff]  ;;  %v676_v28 = vsub.s32 0, %v1226_v17 }
  0x16   : > { %v672_v29 = vld [vmem:[%s1367_s4] sm:$0x3] }
  0x17   : > { %992 = vmatpush3.bf16.msra.mxu0 %v1064_v10 }
  0x18   : > { %1012 = vmatpush3.bf16.msra.mxu1 %v1065_v11  ;;  %993 = vmatprep.subr.bf16.mxu0 %v1112_v1 }
  0x19   : > { %1013 = vmatprep.subr.bf16.mxu1 %v1112_v1 }
  0x1b   : > { %994 = vmatpush3.bf16.msra.mxu0 %v1066_v13 }
  0x1c   : > { %1014 = vmatpush3.bf16.msra.mxu1 %v1067_v14  ;;  %995 = vmatprep.subr.bf16.mxu0 %v1112_v1 }
  0x1d   : > { %1015 = vmatprep.subr.bf16.mxu1 %v1112_v1 }
  0x1f   : > { %996 = vmatpush3.bf16.msra.mxu0 %v1068_v18 }
  0x20   : > { %1016 = vmatpush3.bf16.msra.mxu1 %v1069_v21  ;;  %997 = vmatprep.subr.bf16.mxu0 %v1112_v1 }
  0x21   : > { %1017 = vmatprep.subr.bf16.mxu1 %v1112_v1 }
  0x23   : > { %998 = vmatpush3.bf16.msra.mxu0 %v1070_v22 }
  0x24   : > { %1018 = vmatpush3.bf16.msra.mxu1 %v1071_v24  ;;  %1023 = vmatprep.subr.bf16.mxu0 %v1112_v1 }
  0x25   : > { %764 = vmatprep.subr.bf16.mxu1 %v1082_v46 }
  0x26   : > { %1000 = vmatmul.mubr.bf16.vlgmr.msra.gmra.mrb[0].mxu0 %v314_v31  ;;  %v677_v31 = vrot.slane %v672_v29, %v676_v28 }
  0x27   : > { %1024 = vmatpush3.bf16.msra.mxu0 %v1072_v30  ;;  %1020 = vmatmul.mubr.bf16.vlgmr.msra.gmra.mrb[0].mxu1 %v294_v32  ;;  %v680_v30 = vsub.s32 1, %v1226_v17 }
  0x28   : > { %1025 = vmatprep.subr.bf16.mxu0 %v1112_v1  ;;  %1039 = vmatprep.mubr.msk.bf16.mxu0 %vm1113_vm0, %v1112_v1 }
  0x29   : > { %796 = vmatprep.mubr.bf16.mxu1 %v1114_v7  ;;  %765 = vmatpush1.bf16.msra.mxu1 %v1080_v45  ;;  %v681_v32 = vrot.slane %v672_v29, %v680_v30 }
  0x2a   : > { %766 = vmatprep.subr.bf16.mxu1 %v1085_v47 }
  0x2b   : > { %1026 = vmatpush3.bf16.msra.mxu0 %v1073_v33 }
  0x2c   : > { %1027 = vmatprep.subr.bf16.mxu0 %v1112_v1 }
  0x2d   : > { %767 = vmatpush1.bf16.msra.mxu1 %v1083_v48 }
  0x2e   : > { %768 = vmatprep.subr.bf16.mxu1 %v1088_v49 }
  0x2f   : > { %1028 = vmatpush3.bf16.msra.mxu0 %v1074_v34 }
  0x30   : > { %1029 = vmatprep.subr.bf16.mxu0 %v1112_v1 }
  0x31   : > { %769 = vmatpush1.bf16.msra.mxu1 %v1086_v50 }
  0x32   : > { %770 = vmatprep.subr.bf16.mxu1 %v1091_v51 }
  0x33   : > { %1030 = vmatpush3.bf16.msra.mxu0 %v1075_v35 }
  0x34   : > { %1031 = vmatprep.subr.bf16.mxu0 %v1112_v1 }
  0x35   : > { %771 = vmatpush1.bf16.msra.mxu1 %v1089_v52 }
  0x36   : > { %772 = vmatprep.subr.bf16.mxu1 %v1094_v53 }
  0x37   : > { %1032 = vmatpush3.bf16.msra.mxu0 %v1076_v36 }
  0x38   : > { %1033 = vmatprep.subr.bf16.mxu0 %v1112_v1 }
  0x39   : > { %773 = vmatpush1.bf16.msra.mxu1 %v1092_v54 }
  0x3a   : > { %774 = vmatprep.subr.bf16.mxu1 %v1097_v55 }
  0x3b   : > { %1034 = vmatpush3.bf16.msra.mxu0 %v1077_v37 }
  0x3c   : > { %1035 = vmatprep.subr.bf16.mxu0 %v1112_v1 }
  0x3d   : > { %775 = vmatpush1.bf16.msra.mxu1 %v1095_v56 }
  0x3e   : > { %776 = vmatprep.subr.bf16.mxu1 %v1100_v57 }
  0x3f   : > { %1036 = vmatpush3.bf16.msra.mxu0 %v1078_v38 }
  0x40   : > { %1037 = vmatprep.subr.bf16.mxu0 %v1112_v1 }
  0x41   : > { %777 = vmatpush1.bf16.msra.mxu1 %v1098_v58 }
  0x42   : > { %778 = vmatprep.subr.bf16.mxu1 %v1103_v59 }
  0x43   : > { %1038 = vmatpush3.bf16.msra.mxu0 %v1079_v41 }
  0x45   : > { %779 = vmatpush1.bf16.msra.mxu1 %v1101_v60 }
  0x46   : > { %1040 = vmatmul.mubr.bf16.vlgmr.msra.gmra.mrb[4].mxu0 %v523_v44 }
  0x8a   : > { %v423_v61 = vpop.permute.xlu0 %422 }
  0x8c   : > { %v633_v11 = vpop.permute.xlu1 %632 }
  0x8e   : > { %v428_v63 = vpop.permute.xlu0 %427 }
  0x90   : > { %v638_v15 = vpop.permute.xlu1 %637 }
  0xf9   : > { %v413_v62 = vpop.f32.mrb[0].mxu0 }
  0xfa   : > { %v430_v0 = vmul.f32 %v423_v61, %v413_v62  ;;  %v1001_v1 = vpop.f32.mrb[1].mxu0  ;;  %v514_v2 = vpop.f32.mrb[0].mxu1 }
  0xfb   : > { %v416_v3 = vpop.f32.mrb[2].mxu0  ;;  %v1021_v4 = vpop.f32.mrb[1].mxu1 }
  0xfc   : > { %v431_v5 = vmul.f32 %v428_v63, %v416_v3  ;;  %v515_v6 = vadd.f32 %v514_v2, %v430_v0  ;;  %v1002_v7 = vpop.f32.mrb[3].mxu0  ;;  %v517_v8 = vpop.f32.mrb[2].mxu1 }
  0xfd   : > { %v1022_v9 = vpop.f32.mrb[3].mxu1 }
  0xfe   : > { %v518_v10 = vadd.f32 %v517_v8, %v431_v5 }
 0x119   : > { %v623_v12 = vpop.f32.mrb[4].mxu0 }
 0x11a   : > { %v640_v13 = vmul.f32 %v633_v11, %v623_v12  ;;  %v1041_v14 = vpop.f32.mrb[5].mxu0 }
 0x11b   : > { %v626_v18 = vpop.f32.mrb[6].mxu0 }
 0x11c   : > { %v642_v19 = vadd.f32 %v640_v13, %v515_v6  ;;  %v641_v20 = vmul.f32 %v638_v15, %v626_v18  ;;  %v1042_v21 = vpop.f32.mrb[7].mxu0 }
 0x11e   : > { %v651_v22 = vadd.f32 %v935_v16, %v642_v19  ;;  %v643_v23 = vadd.f32 %v641_v20, %v518_v10 }
 0x120   : > { %v652_v24 = vadd.f32 %v935_v16, %v643_v23  ;;  %v653_v25 = vmax.f32 %v651_v22, 0.0 }
 0x122   : > { %v654_v26 = vmax.f32 %v652_v24, 0.0 }
 0x124   : > { %v655_v27 = vpack.c.bf16 %v654_v26, %v653_v25 }
 0x126   : > { %797 = vmatmul.mubr.bf16.vlgmr.msra.gmra.mrb[4].mxu1 %v655_v27 }
 0x1f9   : > { %v798_v33 = vpop.f32.mrb[4].mxu1 }
 0x1fa   : > { %v799_v34 = vadd.f32 %v798_v33, %v677_v31  ;;  %v800_v35 = vpop.f32.mrb[5].mxu1 }
 0x1fb   : > { %v801_v36 = vadd.f32 %v800_v35, %v681_v32  ;;  %v802_v37 = vpop.f32.mrb[6].mxu1 }
 0x1fc   : > { %v807_v38 = vmax.f32 %v799_v34, 0.0  ;;  %v803_v39 = vadd.f32 %v802_v37, %v677_v31  ;;  %v804_v40 = vpop.f32.mrb[7].mxu1 }
 0x1fd   : > { %v808_v41 = vmax.f32 %v801_v36, 0.0  ;;  %v805_v42 = vadd.f32 %v804_v40, %v681_v32 }
 0x1fe   : > { %811 = vst [vmem:[%s278_s18] sm:$0xff] %v807_v38  ;;  %v809_v43 = vmax.f32 %v803_v39, 0.0 }
 0x1ff   : > { %812 = vst [vmem:[%s278_s18 + $0x8] sm:$0xff] %v808_v41  ;;  %v810_v17 = vmax.f32 %v805_v42, 0.0 }
 0x200   : > { %813 = vst [vmem:[%s278_s18 + $0x10] sm:$0xff] %v809_v43 }
 0x201   : > { %814 = vst [vmem:[%s278_s18 + $0x18] sm:$0xff] %v810_v17 }
 0x202 PF: > { %s17_s24 = sadd.s32 1, %s1110_s24  }
 0x203   : > { %p14_p4 = scmp.ge.s32.totalorder %s17_s24, 4  }
 0x205   :  { %16 = sbr.rel (!%p14_p4) target bundleno = 1 (0x1), region = 80 }

</bundles_post_ra>
